<compile_context>
chip_gen: v7x
topology: tpu7x:2x2x1
jax: 0.10.0
libtpu: 0.0.40
codegen_flags: <defaults>
</compile_context>

<pallas_src>
import jax
import jax.numpy as jnp
from jax.experimental import pallas as pl
from jax.experimental.pallas import tpu as pltpu

_LANE = 128


def phys_loss_kernel(x_ref, y_ref, w1x_ref, w1y_ref, b1_ref, w2_ref, b2_ref,
                     loss_ref):
    x = x_ref[...]          # (1, TN)  samples on lanes
    y = y_ref[...]          # (1, TN)
    w1x = w1x_ref[...]      # (H, 1)
    w1y = w1y_ref[...]      # (H, 1)
    b1 = b1_ref[...]        # (H, 1)
    w2 = w2_ref[...]        # (H, 1)
    b2 = b2_ref[0]          # scalar (SMEM)

    # Per-hidden-unit coefficients, formed once per grid step (only H elems).
    c_dd = w2 * (w1x * w1x - w1y * w1y)   # fused coeff for (u_xx - u_yy)
    c_dy = w2 * w1y                       # coeff for du/dy at y = 0

    # u = model(x, y): closed-form second-derivative difference.
    z = w1x * x + w1y * y + b1            # (H, TN)
    h = jnp.tanh(z)
    d2act = -2.0 * h * (1.0 - h * h)      # tanh''(z)
    dd = jnp.sum(c_dd * d2act, axis=0, keepdims=True)       # u_xx - u_yy

    # u1 = model(0, y)
    h1 = jnp.tanh(w1y * y + b1)
    u1 = jnp.sum(w2 * h1, axis=0, keepdims=True) + b2

    # dy1 = d model(x, y)/dy evaluated at y = 0
    h2 = jnp.tanh(w1x * x + b1)
    dy1 = jnp.sum(c_dy * (1.0 - h2 * h2), axis=0, keepdims=True)

    loss_ref[...] = dd * dd + u1 * u1 + (dy1 - jnp.sin(x)) ** 2


def phys_loss(x, y, params, *, tile_n=2048):
    """x, y: (N, 1) float32.  Returns per-sample loss of shape (N, 1)."""
    w1x, w1y, b1, w2, b2 = params
    N = x.shape[0]
    H = w1x.shape[1]

    # Transpose working layout: samples -> lanes, hidden units -> sublanes.
    xr = x.reshape(1, N)
    yr = y.reshape(1, N)
    w1x_c = w1x.reshape(H, 1)
    w1y_c = w1y.reshape(H, 1)
    b1_c = b1.reshape(H, 1)
    w2_c = w2.reshape(H, 1)
    b2_s = b2.reshape(1)

    # Pad sample count to a lane multiple; pick a large tile but keep the
    # grid length >= 2 so both TensorCores get work on v7x.
    n_lane = -(-N // _LANE) * _LANE
    tile = min(max(tile_n, _LANE), n_lane)
    tile = -(-tile // _LANE) * _LANE
    if n_lane >= 2 * _LANE and tile > n_lane // 2:
        tile = max(_LANE, (n_lane // (2 * _LANE)) * _LANE)
    n_total = -(-n_lane // tile) * tile
    if n_total != N:
        pad = n_total - N
        xr = jnp.pad(xr, ((0, 0), (0, pad)))
        yr = jnp.pad(yr, ((0, 0), (0, pad)))

    wspec = pl.BlockSpec((H, 1), lambda i: (0, 0))
    out = pl.pallas_call(
        phys_loss_kernel,
        out_shape=jax.ShapeDtypeStruct((1, n_total), jnp.float32),
        grid_spec=pltpu.PrefetchScalarGridSpec(
            num_scalar_prefetch=0,
            grid=(n_total // tile,),
            in_specs=[
                pl.BlockSpec((1, tile), lambda i: (0, i)),   # x
                pl.BlockSpec((1, tile), lambda i: (0, i)),   # y
                wspec,                                       # w1x
                wspec,                                       # w1y
                wspec,                                       # b1
                wspec,                                       # w2
                pl.BlockSpec(memory_space=pltpu.MemorySpace.SMEM),  # b2
            ],
            out_specs=pl.BlockSpec((1, tile), lambda i: (0, i)),
        ),
        compiler_params=pltpu.CompilerParams(
            dimension_semantics=("parallel",)),
    )(xr, yr, w1x_c, w1y_c, b1_c, w2_c, b2_s)

    return out[0, :N][:, None]


# ---------------------------------------------------------------------------
# Pure-JAX reference (uses jax.grad, mirroring the torch.autograd.grad calls)
# ---------------------------------------------------------------------------
def _model_scalar(xs, ys, params):
    w1x, w1y, b1, w2, b2 = params
    z = xs * w1x[0] + ys * w1y[0] + b1[0]
    return jnp.sum(w2[0] * jnp.tanh(z)) + b2[0, 0]


def phys_loss_ref(x, y, params):
    xs = x[:, 0]
    ys = y[:, 0]

    def per_sample(xi, yi):
        u_xx = jax.grad(jax.grad(_model_scalar, argnums=0), argnums=0)(
            xi, yi, params)
        u_yy = jax.grad(jax.grad(_model_scalar, argnums=1), argnums=1)(
            xi, yi, params)
        u1 = _model_scalar(jnp.float32(0.0), yi, params)
        dy1 = jax.grad(_model_scalar, argnums=1)(xi, jnp.float32(0.0), params)
        return (u_xx - u_yy) ** 2 + u1 ** 2 + (dy1 - jnp.sin(xi)) ** 2

    return jax.vmap(per_sample)(xs, ys)[:, None]


if __name__ == "__main__":
    key = jax.random.PRNGKey(0)
    N, H = 256, 32
    k1, k2, k3, k4, k5, k6, k7 = jax.random.split(key, 7)

    # Deterministic synthetic model parameters (2-layer tanh MLP).
    w1x = 0.5 * jax.random.normal(k1, (1, H), jnp.float32)
    w1y = 0.5 * jax.random.normal(k2, (1, H), jnp.float32)
    b1 = 0.1 * jax.random.normal(k3, (1, H), jnp.float32)
    w2 = 0.5 * jax.random.normal(k4, (1, H), jnp.float32)
    b2 = 0.1 * jax.random.normal(k5, (1, 1), jnp.float32)
    params = (w1x, w1y, b1, w2, b2)

    x = jax.random.uniform(k6, (N, 1), jnp.float32, -1.0, 1.0)
    y = jax.random.uniform(k7, (N, 1), jnp.float32, -1.0, 1.0)

    out = phys_loss(x, y, params)
    out = jax.block_until_ready(out)

    ref = phys_loss_ref(x, y, params)
    assert out.shape == (N, 1)
    assert jnp.allclose(out, ref, rtol=1e-3, atol=1e-4), (
        float(jnp.max(jnp.abs(out - ref))))

    print("KERNEL_OK")
</pallas_src>

<mosaic_0001>
module attributes {stable_mosaic.version = 11 : i64} {
  func.func @phys_loss_kernel(%arg0: i32, %arg1: memref<1x128xf32, #tpu.memory_space<vmem>>, %arg2: memref<1x128xf32, #tpu.memory_space<vmem>>, %arg3: memref<32x1xf32, #tpu.memory_space<vmem>>, %arg4: memref<32x1xf32, #tpu.memory_space<vmem>>, %arg5: memref<32x1xf32, #tpu.memory_space<vmem>>, %arg6: memref<32x1xf32, #tpu.memory_space<vmem>>, %arg7: memref<1xf32, #tpu.memory_space<smem>>, %arg8: memref<1x128xf32, #tpu.memory_space<vmem>>) attributes {dimension_semantics = [#tpu.dimension_semantics<parallel>], iteration_bounds = array<i64: 2>, scalar_prefetch = 0 : i64, scratch_operands = 0 : i64, tpu.core_type = #tpu.core_type<tc>, window_params = [{transform_indices = @transform_0, window_bounds = array<i64: 1, 128>}, {transform_indices = @transform_1, window_bounds = array<i64: 1, 128>}, {pipeline_mode = #tpu.pipeline_mode<synchronous>, transform_indices = @transform_2, window_bounds = array<i64: 32, 1>}, {pipeline_mode = #tpu.pipeline_mode<synchronous>, transform_indices = @transform_3, window_bounds = array<i64: 32, 1>}, {pipeline_mode = #tpu.pipeline_mode<synchronous>, transform_indices = @transform_4, window_bounds = array<i64: 32, 1>}, {pipeline_mode = #tpu.pipeline_mode<synchronous>, transform_indices = @transform_5, window_bounds = array<i64: 32, 1>}, {transform_indices = @transform_6, window_bounds = array<i64: 1>}, {transform_indices = @transform_7, window_bounds = array<i64: 1, 128>}]} {
    %c0 = arith.constant 0 : index
    %c0_0 = arith.constant 0 : index
    %0 = vector.load %arg1[%c0, %c0_0] : memref<1x128xf32, #tpu.memory_space<vmem>>, vector<1x128xf32>
    %c0_1 = arith.constant 0 : index
    %c0_2 = arith.constant 0 : index
    %1 = vector.load %arg2[%c0_1, %c0_2] : memref<1x128xf32, #tpu.memory_space<vmem>>, vector<1x128xf32>
    %c0_3 = arith.constant 0 : index
    %c0_4 = arith.constant 0 : index
    %2 = vector.load %arg3[%c0_3, %c0_4] : memref<32x1xf32, #tpu.memory_space<vmem>>, vector<32x1xf32>
    %c0_5 = arith.constant 0 : index
    %c0_6 = arith.constant 0 : index
    %3 = vector.load %arg4[%c0_5, %c0_6] : memref<32x1xf32, #tpu.memory_space<vmem>>, vector<32x1xf32>
    %c0_7 = arith.constant 0 : index
    %c0_8 = arith.constant 0 : index
    %4 = vector.load %arg5[%c0_7, %c0_8] : memref<32x1xf32, #tpu.memory_space<vmem>>, vector<32x1xf32>
    %c0_9 = arith.constant 0 : index
    %c0_10 = arith.constant 0 : index
    %5 = vector.load %arg6[%c0_9, %c0_10] : memref<32x1xf32, #tpu.memory_space<vmem>>, vector<32x1xf32>
    %c0_11 = arith.constant 0 : index
    %6 = memref.load %arg7[%c0_11] : memref<1xf32, #tpu.memory_space<smem>>
    %7 = arith.mulf %2, %2 : vector<32x1xf32>
    %8 = arith.mulf %3, %3 : vector<32x1xf32>
    %9 = arith.subf %7, %8 : vector<32x1xf32>
    %10 = arith.mulf %5, %9 : vector<32x1xf32>
    %11 = arith.mulf %5, %3 : vector<32x1xf32>
    %12 = vector.broadcast %2 : vector<32x1xf32> to vector<32x128xf32>
    %13 = vector.broadcast %0 : vector<1x128xf32> to vector<32x128xf32>
    %14 = arith.mulf %12, %13 : vector<32x128xf32>
    %15 = vector.broadcast %3 : vector<32x1xf32> to vector<32x128xf32>
    %16 = vector.broadcast %1 : vector<1x128xf32> to vector<32x128xf32>
    %17 = arith.mulf %15, %16 : vector<32x128xf32>
    %18 = arith.addf %14, %17 : vector<32x128xf32>
    %19 = vector.broadcast %4 : vector<32x1xf32> to vector<32x128xf32>
    %20 = arith.addf %18, %19 : vector<32x128xf32>
    %21 = math.tanh %20 : vector<32x128xf32>
    %cst = arith.constant -2.000000e+00 : f32
    %22 = vector.broadcast %cst : f32 to vector<32x128xf32>
    %23 = arith.mulf %22, %21 : vector<32x128xf32>
    %24 = arith.mulf %21, %21 : vector<32x128xf32>
    %cst_12 = arith.constant 1.000000e+00 : f32
    %25 = vector.broadcast %cst_12 : f32 to vector<32x128xf32>
    %26 = arith.subf %25, %24 : vector<32x128xf32>
    %27 = arith.mulf %23, %26 : vector<32x128xf32>
    %28 = vector.broadcast %10 : vector<32x1xf32> to vector<32x128xf32>
    %29 = arith.mulf %28, %27 : vector<32x128xf32>
    %cst_13 = arith.constant dense<0.000000e+00> : vector<128xf32>
    %30 = vector.multi_reduction <add>, %29, %cst_13 [0] : vector<32x128xf32> to vector<128xf32>
    %31 = vector.shape_cast %30 : vector<128xf32> to vector<1x128xf32>
    %32 = vector.broadcast %3 : vector<32x1xf32> to vector<32x128xf32>
    %33 = vector.broadcast %1 : vector<1x128xf32> to vector<32x128xf32>
    %34 = arith.mulf %32, %33 : vector<32x128xf32>
    %35 = vector.broadcast %4 : vector<32x1xf32> to vector<32x128xf32>
    %36 = arith.addf %34, %35 : vector<32x128xf32>
    %37 = math.tanh %36 : vector<32x128xf32>
    %38 = vector.broadcast %5 : vector<32x1xf32> to vector<32x128xf32>
    %39 = arith.mulf %38, %37 : vector<32x128xf32>
    %cst_14 = arith.constant dense<0.000000e+00> : vector<128xf32>
    %40 = vector.multi_reduction <add>, %39, %cst_14 [0] : vector<32x128xf32> to vector<128xf32>
    %41 = vector.shape_cast %40 : vector<128xf32> to vector<1x128xf32>
    %42 = vector.broadcast %6 : f32 to vector<1x128xf32>
    %43 = arith.addf %41, %42 : vector<1x128xf32>
    %44 = vector.broadcast %2 : vector<32x1xf32> to vector<32x128xf32>
    %45 = vector.broadcast %0 : vector<1x128xf32> to vector<32x128xf32>
    %46 = arith.mulf %44, %45 : vector<32x128xf32>
    %47 = vector.broadcast %4 : vector<32x1xf32> to vector<32x128xf32>
    %48 = arith.addf %46, %47 : vector<32x128xf32>
    %49 = math.tanh %48 : vector<32x128xf32>
    %50 = arith.mulf %49, %49 : vector<32x128xf32>
    %cst_15 = arith.constant 1.000000e+00 : f32
    %51 = vector.broadcast %cst_15 : f32 to vector<32x128xf32>
    %52 = arith.subf %51, %50 : vector<32x128xf32>
    %53 = vector.broadcast %11 : vector<32x1xf32> to vector<32x128xf32>
    %54 = arith.mulf %53, %52 : vector<32x128xf32>
    %cst_16 = arith.constant dense<0.000000e+00> : vector<128xf32>
    %55 = vector.multi_reduction <add>, %54, %cst_16 [0] : vector<32x128xf32> to vector<128xf32>
    %56 = vector.shape_cast %55 : vector<128xf32> to vector<1x128xf32>
    %57 = arith.mulf %31, %31 : vector<1x128xf32>
    %58 = arith.mulf %43, %43 : vector<1x128xf32>
    %59 = arith.addf %57, %58 : vector<1x128xf32>
    %60 = math.sin %0 : vector<1x128xf32>
    %61 = arith.subf %56, %60 : vector<1x128xf32>
    %62 = arith.mulf %61, %61 : vector<1x128xf32>
    %63 = arith.addf %59, %62 : vector<1x128xf32>
    %c0_17 = arith.constant 0 : index
    %c0_18 = arith.constant 0 : index
    %64 = vector.load %arg8[%c0_17, %c0_18] : memref<1x128xf32, #tpu.memory_space<vmem>>, vector<1x128xf32>
    tpu.vector_store %arg8[%c0_17, %c0_18], %63 {strides = array<i32>} : memref<1x128xf32, #tpu.memory_space<vmem>>, vector<1x128xf32>,
    return
  }
  func.func @transform_0(%arg0: i32) -> (i32, i32) {
    %c0_i32 = arith.constant 0 : i32
    %c0_i32_0 = arith.constant 0 : i32
    return %c0_i32, %arg0 : i32, i32
  }
  func.func @transform_1(%arg0: i32) -> (i32, i32) {
    %c0_i32 = arith.constant 0 : i32
    %c0_i32_0 = arith.constant 0 : i32
    return %c0_i32, %arg0 : i32, i32
  }
  func.func @transform_2(%arg0: i32) -> (i32, i32) {
    %c0_i32 = arith.constant 0 : i32
    %c0_i32_0 = arith.constant 0 : i32
    %c0_i32_1 = arith.constant 0 : i32
    return %c0_i32, %c0_i32_0 : i32, i32
  }
  func.func @transform_3(%arg0: i32) -> (i32, i32) {
    %c0_i32 = arith.constant 0 : i32
    %c0_i32_0 = arith.constant 0 : i32
    %c0_i32_1 = arith.constant 0 : i32
    return %c0_i32, %c0_i32_0 : i32, i32
  }
  func.func @transform_4(%arg0: i32) -> (i32, i32) {
    %c0_i32 = arith.constant 0 : i32
    %c0_i32_0 = arith.constant 0 : i32
    %c0_i32_1 = arith.constant 0 : i32
    return %c0_i32, %c0_i32_0 : i32, i32
  }
  func.func @transform_5(%arg0: i32) -> (i32, i32) {
    %c0_i32 = arith.constant 0 : i32
    %c0_i32_0 = arith.constant 0 : i32
    %c0_i32_1 = arith.constant 0 : i32
    return %c0_i32, %c0_i32_0 : i32, i32
  }
  func.func @transform_6(%arg0: i32) -> i32 {
    %c0_i32 = arith.constant 0 : i32
    %c0_i32_0 = arith.constant 0 : i32
    return %c0_i32 : i32
  }
  func.func @transform_7(%arg0: i32) -> (i32, i32) {
    %c0_i32 = arith.constant 0 : i32
    %c0_i32_0 = arith.constant 0 : i32
    return %c0_i32, %arg0 : i32, i32
  }
}

</mosaic_0001>

<bundles_post_ra>
// kernel: tpu_custom_call.1
= control target key start
LH: loop header
LB: loop body
LE: loop exit
PB: predicated region body
PF: predicated region fallthrough
CT: control target
= control target key end

     0   :  { %s1155_s0 = inlined_call_operand.vmem [shape: f32[1,256], index: 0, kind: input, shape index: {}]   ;;  %s1156_s1 = inlined_call_operand.vmem [shape: f32[1,256], index: 1, kind: input, shape index: {}]   ;;  %s1157_s2 = inlined_call_operand.vmem [shape: f32[32,1], index: 2, kind: input, shape index: {}]   ;;  %s1158_s3 = inlined_call_operand.vmem [shape: f32[32,1], index: 3, kind: input, shape index: {}]   ;;  %s1159_s4 = inlined_call_operand.vmem [shape: f32[32,1], index: 4, kind: input, shape index: {}]   ;;  %s1160_s5 = inlined_call_operand.vmem [shape: f32[32,1], index: 5, kind: input, shape index: {}]   ;;  %s1161_s6 = inlined_call_operand.<no memory space> [shape: f32[1], index: 6, kind: input, shape index: {}]   ;;  %s1162_s7 = inlined_call_operand.hbm [shape: f32[1,256], index: 7, kind: output, shape index: {}]  }
   0x1   :  { %12 = sst [smem:[#allocation2]] %s1161_s6 }
   0x2   :  { %13 = vsyncpa [#allocation4], 0 }
   0x3   :  { %15 = vsyncpa [#allocation4 + $0x1], 0  ;;  %s949_s26 = smov 0   ;;  %s951_s27 = smov 0  }
   0x4   :  { %s953_s28 = smov 0   ;;  %s955_s29 = smov 0  }
   0x5 LB: > { %s970_s6 = sadd.s32 4294967295, %s896_s29   ;;  %s742_s30 = sadd.s32 4294967294, %s896_s29   ;;  %s896_s29 = sphi %s955_s29, %s1170_s29   ;;  %s892_s28 = sphi %s953_s28, %s1169_s28   ;;  %s888_s27 = sphi %s951_s27, %s1168_s27   ;;  %s884_s26 = sphi %s949_s26, %s1167_s26  }
   0x6   : > { %s974_s8 = sadd.s32 1, %s896_s29   ;;  %s185_s9 = sadd.s32 1, %s892_s28 }
   0x7   : > { %s182_s10 = ssub.s32 %s896_s29, %s974_s8  ;;  %p195_p0 = scmp.ne.s32.totalorder %s892_s28, %s888_s27 }
   0x8   : > { %p183_p1 = scmp.eq.s32.totalorder %s182_s10, 0  ;;  %p196_p2 = scmp.eq.s32.totalorder %s970_s6, 1 }
   0x9   : > { %p201_p3 = scmp.ne.s32.totalorder %s888_s27, %s884_s26  ;;  %p202_p4 = scmp.eq.s32.totalorder %s742_s30, 1 }
   0xa   : > { %s985_s11 = scalar_select %p183_p1, %s892_s28, %s185_s9  }
   0xb   : > { %p987_p5 = por %p196_p2, %p195_p0  ;;  %p991_p6 = por %p202_p4, %p201_p3 }
   0xc   : > { %p745_p7 = scmp.ge.s32.totalorder %s896_s29, 1  ;;  %p247_p8 = scmp.lt.s32.totalorder %s896_s29, 3 }
   0xe   : > { %p248_p9 = pnand %p745_p7, %p247_p8 }
   0xf   : > { %v291_v0 = vld [vmem:[%s1158_s3] sm:$0xff] (!%p248_p9)  ;;  %v898_v2 = vmov (!%p248_p9), 0   ;;  %v292_v3 = vld [vmem:[%s1158_s3 + $0x8] sm:$0xff] (!%p248_p9)  ;;  %v293_v5 = vld [vmem:[%s1158_s3 + $0x10] sm:$0xff] (!%p248_p9)  ;;  %p279_p10 = scmp.lt.s32.totalorder (!%p248_p9), %s970_s6, 1  ;;  %s277_s24 = sand.u32 (!%p248_p9), 1, %s888_s27  }
  0x10   : > { %251 = sbr.rel (%p248_p9) target bundleno = 226 (0xe2), region = 48  ;;  %v287_v1 = vld [vmem:[%s1157_s2] sm:$0xff] (!%p248_p9)  ;;  %805 = vset.pattern.permute.xlu1 (!%p248_p9), %v898_v2  ;;  %804 = vset.pattern.permute.xlu0 (!%p248_p9), %v898_v2  ;;  %v288_v4 = vld [vmem:[%s1157_s2 + $0x8] sm:$0xff] (!%p248_p9)  ;;  %v289_v6 = vld [vmem:[%s1157_s2 + $0x10] sm:$0xff] (!%p248_p9)  ;;  %v308_v11 = vmul.f32 (!%p248_p9), %v291_v0, %v291_v0  ;;  %v309_v13 = vmul.f32 (!%p248_p9), %v292_v3, %v292_v3  ;;  %v310_v22 = vmul.f32 (!%p248_p9), %v293_v5, %v293_v5  ;;  %v899_v45 = vmov (!%p248_p9), 2102212464  }
  0x11   : > { %356 = vperm.xlu1 (!%p248_p9), %805, %v291_v0   ;;  %326 = vperm.xlu0 (!%p248_p9), %804, %v287_v1   ;;  %v294_v7 = vld [vmem:[%s1158_s3 + $0x18] sm:$0xff] (!%p248_p9)  ;;  %v296_v9 = vld [vmem:[%s1159_s4 + $0x8] sm:$0xff] (!%p248_p9)  ;;  %v295_v10 = vld [vmem:[%s1159_s4] sm:$0xff] (!%p248_p9)  ;;  %v304_v12 = vmul.f32 (!%p248_p9), %v287_v1, %v287_v1  ;;  %v305_v14 = vmul.f32 (!%p248_p9), %v288_v4, %v288_v4  ;;  %v306_v23 = vmul.f32 (!%p248_p9), %v289_v6, %v289_v6  ;;  %v900_v47 = vmov (!%p248_p9), 920167782   ;;  %s751_s25 = sshll.u32 (!%p248_p9), %s970_s6, 4 }
  0x12   : > { %v290_v8 = vld [vmem:[%s1157_s2 + $0x18] sm:$0xff] (!%p248_p9)  ;;  %v297_v16 = vld [vmem:[%s1159_s4 + $0x10] sm:$0xff] (!%p248_p9)  ;;  %v300_v19 = vld [vmem:[%s1160_s5 + $0x8] sm:$0xff] (!%p248_p9)  ;;  %v311_v31 = vmul.f32 (!%p248_p9), %v294_v7, %v294_v7  ;;  %v901_v52 = vmov (!%p248_p9), 1326507024   ;;  %s1113_s15 = scalar_lea.hbm (!%p248_p9), %s1162_s7, %s751_s25  ;;  %s669_s16 = scalar_lea.sflag (!%p248_p9), [#allocation4], %s277_s24 }
  0x13   : > { %v298_v15 = vld [vmem:[%s1159_s4 + $0x18] sm:$0xff] (!%p248_p9)  ;;  %v312_v17 = vsub.f32 (!%p248_p9), %v304_v12, %v308_v11  ;;  %v313_v18 = vsub.f32 (!%p248_p9), %v305_v14, %v309_v13  ;;  %v299_v20 = vld [vmem:[%s1160_s5] sm:$0xff] (!%p248_p9)  ;;  %v314_v27 = vsub.f32 (!%p248_p9), %v306_v23, %v310_v22  ;;  %v301_v29 = vld [vmem:[%s1160_s5 + $0x10] sm:$0xff] (!%p248_p9)  ;;  %v307_v32 = vmul.f32 (!%p248_p9), %v290_v8, %v290_v8 }
  0x14   : > { %v320_v28 = vmul.f32 (!%p248_p9), %v299_v20, %v291_v0  ;;  %v321_v34 = vmul.f32 (!%p248_p9), %v300_v19, %v292_v3  ;;  %v322_v37 = vmul.f32 (!%p248_p9), %v301_v29, %v293_v5  ;;  %v302_v38 = vld [vmem:[%s1160_s5 + $0x18] sm:$0xff] (!%p248_p9)  ;;  %v902_v54 = vmov (!%p248_p9), 683565275  }
  0x15   : > { %361 = vperm.xlu1 (!%p248_p9), %805, %v292_v3   ;;  %331 = vperm.xlu0 (!%p248_p9), %804, %v288_v4   ;;  %v317_v24 = vmul.f32 (!%p248_p9), %v313_v18, %v300_v19  ;;  %v316_v25 = vmul.f32 (!%p248_p9), %v312_v17, %v299_v20  ;;  %v318_v33 = vmul.f32 (!%p248_p9), %v314_v27, %v301_v29  ;;  %v903_v56 = vmov (!%p248_p9), 2475754826  }
  0x16   : > { %v315_v36 = vsub.f32 (!%p248_p9), %v307_v32, %v311_v31  ;;  %v323_v40 = vmul.f32 (!%p248_p9), %v302_v38, %v294_v7  ;;  %v904_v59 = vmov (!%p248_p9), 2131351028  }
  0x17   : > { %s1029_s19 = scalar_select %p279_p10, %s970_s6, 1 }
  0x18   : > { %v319_v41 = vmul.f32 %v315_v36, %v302_v38  ;;  %s905_s6 = smov [#allocation3]  }
  0x19   : > { %366 = vperm.xlu1 %805, %v293_v5   ;;  %336 = vperm.xlu0 %804, %v289_v6   ;;  %s281_s30 = scalar_lea.vmem %s1155_s0, %s1029_s19  ;;  %s284_s23 = scalar_lea.vmem %s1156_s1, %s1029_s19 }
  0x1a   : > { %v1047_v21 = vld [vmem:[%s281_s30] sm:$0x1]  ;;  %s303_s19 = sld [smem:[#allocation2]]  ;;  %s278_s30 = scalar_lea.vmem [#allocation3], %s277_s24 }
  0x1b   : > { %v563_v26 = vand.u32 2139095040, %v1047_v21  ;;  %v560_v49 = vand.u32 2147483647, %v1047_v21  ;;  %vm562_vm7 = vcmp.lt.s32.totalorder %v1047_v21, 0  ;;  %vm652_vm12 = vweird.f32 %v1047_v21  ;;  %s681_s9 = sshll.u32 %s278_s30, 4  ;;  %s838_s18 = sshll.u32 %s905_s6, 4  ;;  %s1115_s9 = int_to_ptr.vmem [resolvable:$true] %s681_s9  ;;  %s839_s18 = int_to_ptr.vmem [resolvable:$false] %s838_s18 }
  0x1c   : > { %s834_s17 = scalar_lea.vmem %s1115_s9, 16  ;;  %s840_s20 = scalar_lea.vmem %s839_s18, 32 }
  0x1d   : > { %371 = vperm.xlu1 %805, %v294_v7   ;;  %341 = vperm.xlu0 %804, %v290_v8   ;;  %v564_v30 = vshrl.u32 %v563_v26, 23  ;;  %v567_v0 = vand.u32 8388607, %v560_v49  ;;  %vm1092_vm8 = vcmp.le.f32.partialorder %v560_v49, 0.7853982  ;;  %p835_p11 = scmp.ne.s32.totalorder %s1115_s9, %s834_s17  ;;  %p841_p0 = scmp.lt.s32.totalorder %s1115_s9, %s839_s18 }
  0x1e   : > { %p842_p1 = scmp.lt.s32.totalorder %s840_s20, %s834_s17 }
  0x1f   : > { %v747_v35 = vadd.s32 4294967169, %v564_v30  ;;  %v568_v6 = vor.u32 8388608, %v567_v0  ;;  %p836_p12 = pnand %p835_p11, %p987_p5 }
  0x20   : > { %p843_p2 = por %p842_p1, %p841_p0 }
  0x21   : > { %395 = vperm.xlu1 %805, %v296_v9   ;;  %390 = vperm.xlu0 %804, %v295_v10   ;;  %v570_v39 = vadd.s32 1, %v747_v35  ;;  %v608_v12 = vshll.u32 %v568_v6, 8  ;;  %p837_p13 = pneg %p836_p12 }
  0x23   : > { %vm571_vm0 = vcmp.gt.s32.totalorder %v570_v39, 0  ;;  %p844_p3 = pnand %p843_p2, %p837_p13 }
  0x24   : > { %v572_v42 = vsel %vm571_vm0, %v570_v39, 0 }
  0x25   : > { %405 = vperm.xlu1 %805, %v298_v15   ;;  %400 = vperm.xlu0 %804, %v297_v16   ;;  %v574_v43 = vand.u32 31, %v572_v42  ;;  %v573_v50 = vshrl.u32 %v572_v42, 5 }
  0x27   : > { %v575_v44 = vsub.s32 32, %v574_v43  ;;  %v586_v46 = vshll.u32 %v899_v45, %v574_v43  ;;  %v589_v51 = vshll.u32 %v900_v47, %v574_v43  ;;  %v577_v55 = vshll.u32 %v902_v54, %v574_v43 }
  0x28   : > { %v580_v57 = vshll.u32 %v903_v56, %v574_v43  ;;  %v583_v61 = vshll.u32 %v904_v59, %v574_v43  ;;  %vm595_vm1 = vcmp.lt.s32.totalorder %v573_v50, 4  ;;  %vm592_vm2 = vcmp.lt.s32.totalorder %v573_v50, 1 }
  0x29   : > { %480 = vperm.xlu1 %805, %v300_v19   ;;  %475 = vperm.xlu0 %804, %v299_v20   ;;  %v587_v48 = vshrl.u32 %v900_v47, %v575_v44  ;;  %v590_v53 = vshrl.u32 %v901_v52, %v575_v44  ;;  %v578_v58 = vshrl.u32 %v903_v56, %v575_v44  ;;  %vm594_vm3 = vcmp.lt.s32.totalorder %v573_v50, 3 }
  0x2a   : > { %v581_v60 = vshrl.u32 %v904_v59, %v575_v44  ;;  %v584_v62 = vshrl.u32 %v899_v45, %v575_v44  ;;  %vm593_vm4 = vcmp.lt.s32.totalorder %v573_v50, 2  ;;  %v576_v17 = vshrl.u32 %v902_v54, %v575_v44 }
  0x2b   : > { %v588_v63 = vor.u32 %v587_v48, %v586_v46  ;;  %v591_v1 = vor.u32 %v590_v53, %v589_v51  ;;  %v579_v2 = vor.u32 %v578_v58, %v577_v55  ;;  %v746_v53 = vld [vmem:[%s284_s23] ss:$0 sm:$0xff] }
  0x2c   : > { %v582_v3 = vor.u32 %v581_v60, %v580_v57  ;;  %v585_v4 = vor.u32 %v584_v62, %v583_v61 }
  0x2d   : > { %439 = vperm.xlu1 %805, %v317_v24   ;;  %434 = vperm.xlu0 %804, %v316_v25   ;;  %v601_v5 = vsel %vm595_vm1, %v588_v63, 920167782  ;;  %v605_v7 = vsel %vm595_vm1, %v591_v1, 1326507024  ;;  %v596_v22 = vsel %vm592_vm2, %v576_v17, %v579_v2 }
  0x2e   : > { %v600_v8 = vsel %vm592_vm2, %v579_v2, %v582_v3  ;;  %v602_v9 = vsel %vm594_vm3, %v585_v4, %v601_v5  ;;  %v604_v10 = vsel %vm592_vm2, %v582_v3, %v585_v4  ;;  %v606_v11 = vsel %vm594_vm3, %v588_v63, %v605_v7 }
  0x2f   : > { %v603_v13 = vsel %vm593_vm4, %v600_v8, %v602_v9  ;;  %v607_v14 = vsel %vm593_vm4, %v604_v10, %v606_v11  ;;  %v597_v20 = vsel %vm595_vm1, %v585_v4, 2102212464 }
  0x30   : > { %v1067_v15 = vmul.u32.u64.low %v608_v12, %v603_v13  ;;  %v1068_v16 = vmul.u32.u64.high %v608_v12, %v603_v13, %v1067_v15  ;;  %v1070_v18 = vmul.u32.u64.low %v608_v12, %v607_v14  ;;  %v1071_v19 = vmul.u32.u64.high %v608_v12, %v607_v14, %v1070_v18 }
  0x31   : > { %526 = vperm.xlu1 %805, %v320_v28   ;;  %485 = vperm.xlu0 %804, %v301_v29   ;;  %v598_v23 = vsel %vm594_vm3, %v582_v3, %v597_v20 }
  0x32   : > { %v599_v24 = vsel %vm593_vm4, %v596_v22, %v598_v23  ;;  %v618_v25 = vadd.s32 1, %v1068_v16  ;;  %vm617_vm5 = vc.u32 %v1071_v19, %v1067_v15  ;;  %v616_v46 = vadd.s32 %v1067_v15, %v1071_v19 }
  0x33   : > { %v615_v26 = vmul.u32 %v608_v12, %v599_v24 }
  0x34   : > { %v619_v27 = vsel %vm617_vm5, %v618_v25, %v1068_v16 }
  0x35   : > { %444 = vperm.xlu1 %805, %v318_v33   ;;  %531 = vperm.xlu0 %804, %v321_v34   ;;  %v620_v28 = vadd.s32 %v619_v27, %v615_v26 }
  0x37   : > { %v621_v29 = vadd.s32 536870912, %v620_v28 }
  0x39   : > { %536 = vperm.xlu1 %805, %v322_v37   ;;  %490 = vperm.xlu0 %804, %v302_v38   ;;  %v1080_v30 = vshrl.u32 %v621_v29, 30  ;;  %v345_v37 = vlaneseq }
  0x3b   : > { %v623_v31 = vshll.u32 %v1080_v30, 30 }
  0x3d   : > { %541 = vperm.xlu1 %805, %v323_v40   ;;  %449 = vperm.xlu0 %804, %v319_v41   ;;  %v624_v32 = vsub.s32 %v620_v28, %v623_v31  ;;  %v346_v40 = vshrl.u32 %v345_v37, 7 }
  0x3f   : > { %v626_v33 = vsub.s32 0, %v624_v32  ;;  %v347_v43 = vsub.s32 0, %v346_v40  ;;  %v646_v40 = vsub.s32 4, %v1080_v30 }
  0x41   : > { %v748_v34 = vmin.u32 %v626_v33, %v624_v32  ;;  %v348_v50 = vrot.slane %v1047_v21, %v347_v43 }
  0x43   : > { %v628_v35 = vclz %v748_v34 }
  0x45   : > { %v749_v36 = vadd.s32 4294967294, %v628_v35 }
  0x47   : > { %vm750_vm6 = vcmp.lt.s32.totalorder %v749_v36, 0 }
  0x48   : > { %v631_v38 = vsel %vm750_vm6, 0, %v749_v36 }
  0x49   : > { %v636_v42 = vsub.s32 4294967266, %v631_v38  ;;  %v632_v47 = vsub.s32 32, %v631_v38  ;;  %v633_v54 = vshll.u32 %v624_v32, %v631_v38 }
  0x4b   : > { %v637_v48 = vadd.s32 127, %v636_v42  ;;  %v634_v55 = vshrl.u32 %v616_v46, %v632_v47 }
  0x4d   : > { %v638_v56 = vshll.u32 %v637_v48, 23  ;;  %v635_v63 = vor.u32 %v634_v55, %v633_v54 }
  0x4f   : > { %v639_v0 = vor.u32 4788187, %v638_v56  ;;  %v642_v7 = vcvt.s32.f32 %v635_v63 }
  0x51   : > { %v640_v11 = vand.u32 2147483647, %v639_v0 }
  0x53   : > { %v643_v22 = vmul.f32 %v642_v7, %v640_v11 }
  0x55   : > { %v644_v29 = vxor.u32 2147483648, %v643_v22 }
  0x57   : > { %v645_v38 = vsel %vm562_vm7, %v644_v29, %v643_v22 }
  0x58   : > { %v648_v49 = vsel %vm1092_vm8, %v1047_v21, %v645_v38 }
  0x90   : > { %v357_v39 = vpop.permute.xlu1 %356  ;;  %v327_v41 = vpop.permute.xlu0 %326 }
  0x91   : > { %v380_v59 = vmul.f32 %v746_v53, %v357_v39  ;;  %v350_v60 = vmul.f32 %v348_v50, %v327_v41 }
  0x93   : > { %v384_v4 = vadd.f32 %v380_v59, %v350_v60 }
  0x94   : > { %v362_v44 = vpop.permute.xlu1 %361  ;;  %v332_v45 = vpop.permute.xlu0 %331 }
  0x95   : > { %v381_v57 = vmul.f32 %v746_v53, %v362_v44  ;;  %v351_v58 = vmul.f32 %v348_v50, %v332_v45 }
  0x97   : > { %v385_v1 = vadd.f32 %v381_v57, %v351_v58 }
  0x98   : > { %v367_v51 = vpop.permute.xlu1 %366  ;;  %v337_v52 = vpop.permute.xlu0 %336 }
  0x99   : > { %v382_v12 = vmul.f32 %v746_v53, %v367_v51  ;;  %v352_v13 = vmul.f32 %v348_v50, %v337_v52 }
  0x9b   : > { %v386_v23 = vadd.f32 %v382_v12, %v352_v13 }
  0x9c   : > { %v372_v61 = vpop.permute.xlu1 %371  ;;  %v342_v62 = vpop.permute.xlu0 %341 }
  0x9d   : > { %v383_v2 = vmul.f32 %v746_v53, %v372_v61  ;;  %v353_v3 = vmul.f32 %v348_v50, %v342_v62  ;;  %v647_v53 = vsel %vm562_vm7, %v646_v40, %v1080_v30 }
  0x9f   : > { %v387_v15 = vadd.f32 %v383_v2, %v353_v3 }
  0xa0   : > { %v396_v5 = vpop.permute.xlu1 %395  ;;  %v391_v6 = vpop.permute.xlu0 %390 }
  0xa1   : > { %v409_v8 = vadd.f32 %v396_v5, %v385_v1  ;;  %v466_v9 = vadd.f32 %v396_v5, %v381_v57  ;;  %v509_v10 = vadd.f32 %v396_v5, %v351_v58  ;;  %v408_v14 = vadd.f32 %v391_v6, %v384_v4 }
  0xa2   : > { %v465_v16 = vadd.f32 %v391_v6, %v380_v59  ;;  %v508_v17 = vadd.f32 %v391_v6, %v350_v60  ;;  %v649_v4 = vsel %vm1092_vm8, 0, %v647_v53 }
  0xa3   : > { %806 = vtanh.f32 %v409_v8 }
  0xa4   : > { %808 = vtanh.f32 %v466_v9  ;;  %v406_v18 = vpop.permute.xlu1 %405  ;;  %v401_v19 = vpop.permute.xlu0 %400 }
  0xa5   : > { %810 = vtanh.f32 %v509_v10  ;;  %v411_v20 = vadd.f32 %v406_v18, %v387_v15  ;;  %v511_v24 = vadd.f32 %v406_v18, %v353_v3  ;;  %v410_v25 = vadd.f32 %v401_v19, %v386_v23 }
  0xa6   : > { %812 = vtanh.f32 %v408_v14  ;;  %v467_v28 = vadd.f32 %v401_v19, %v382_v12  ;;  %v510_v31 = vadd.f32 %v401_v19, %v352_v13  ;;  %v468_v32 = vadd.f32 %v406_v18, %v383_v2 }
  0xa7   : > { %814 = vtanh.f32 %v465_v16 }
  0xa8   : > { %816 = vtanh.f32 %v508_v17  ;;  %v481_v26 = vpop.permute.xlu1 %480  ;;  %v476_v27 = vpop.permute.xlu0 %475 }
  0xa9   : > { %818 = vtanh.f32 %v411_v20 }
  0xaa   : > { %820 = vtanh.f32 %v511_v24 }
  0xab   : > { %822 = vtanh.f32 %v410_v25  ;;  %v653_v25 = vadd.s32 3, %v649_v4 }
  0xac   : > { %v440_v33 = vpop.permute.xlu1 %439  ;;  %v435_v34 = vpop.permute.xlu0 %434  ;;  %824 = vtanh.f32 %v467_v28 }
  0xad   : > { %v807_v35 = vpop.eup %806  ;;  %826 = vtanh.f32 %v510_v31 }
  0xae   : > { %v809_v37 = vpop.eup %808  ;;  %v421_v39 = vmul.f32 %v807_v35, %v807_v35  ;;  %828 = vtanh.f32 %v468_v32  ;;  %v417_v51 = vmul.f32 -2.0, %v807_v35 }
  0xaf   : > { %v811_v41 = vpop.eup %810  ;;  %v494_v50 = vmul.f32 %v809_v37, %v481_v26  ;;  %830 = vcosq.f32 %v648_v49 }
  0xb0   : > { %v813_v42 = vpop.eup %812  ;;  %v425_v43 = vsub.f32 1.0, %v421_v39  ;;  %v527_v44 = vpop.permute.xlu1 %526  ;;  %v517_v52 = vmul.f32 %v811_v41, %v811_v41  ;;  %832 = vsinq.f32 %v648_v49 }
  0xb1   : > { %v486_v45 = vpop.permute.xlu0 %485  ;;  %v815_v46 = vpop.eup %814  ;;  %v420_v47 = vmul.f32 %v813_v42, %v813_v42  ;;  %v416_v56 = vmul.f32 -2.0, %v813_v42 }
  0xb2   : > { %v817_v48 = vpop.eup %816  ;;  %v493_v55 = vmul.f32 %v815_v46, %v476_v27  ;;  %v429_v59 = vmul.f32 %v425_v43, %v417_v51  ;;  %v521_v3 = vsub.f32 1.0, %v517_v52 }
  0xb3   : > { %v819_v54 = vpop.eup %818  ;;  %v424_v57 = vsub.f32 1.0, %v420_v47  ;;  %v516_v58 = vmul.f32 %v817_v48, %v817_v48 }
  0xb4   : > { %v445_v60 = vpop.permute.xlu1 %444  ;;  %v423_v62 = vmul.f32 %v819_v54, %v819_v54  ;;  %v821_v63 = vpop.eup %820  ;;  %v497_v5 = vadd.f32 %v494_v50, %v493_v55  ;;  %v453_v10 = vmul.f32 %v440_v33, %v429_v59  ;;  %v419_v20 = vmul.f32 -2.0, %v819_v54 }
  0xb5   : > { %v532_v61 = vpop.permute.xlu0 %531  ;;  %v428_v0 = vmul.f32 %v424_v57, %v416_v56  ;;  %v823_v1 = vpop.eup %822  ;;  %v520_v2 = vsub.f32 1.0, %v516_v58  ;;  %v519_v7 = vmul.f32 %v821_v63, %v821_v63  ;;  %v506_v63 = vstv %s303_s19 }
  0xb6   : > { %v825_v30 = vpop.eup %824  ;;  %v422_v6 = vmul.f32 %v823_v1, %v823_v1  ;;  %v427_v8 = vsub.f32 1.0, %v423_v62  ;;  %v545_v13 = vmul.f32 %v532_v61, %v521_v3  ;;  %v418_v17 = vmul.f32 -2.0, %v823_v1 }
  0xb7   : > { %v827_v9 = vpop.eup %826  ;;  %v452_v11 = vmul.f32 %v435_v34, %v428_v0  ;;  %v495_v12 = vmul.f32 %v825_v30, %v486_v45  ;;  %v544_v22 = vmul.f32 %v527_v44, %v520_v2  ;;  %v523_v28 = vsub.f32 1.0, %v519_v7 }
  0xb8   : > { %v537_v14 = vpop.permute.xlu1 %536  ;;  %v829_v16 = vpop.eup %828  ;;  %v426_v18 = vsub.f32 1.0, %v422_v6  ;;  %v518_v19 = vmul.f32 %v827_v9, %v827_v9  ;;  %v431_v29 = vmul.f32 %v427_v8, %v419_v20  ;;  %v654_v45 = vand.u32 3, %v653_v25 }
  0xb9   : > { %v491_v15 = vpop.permute.xlu0 %490  ;;  %v498_v23 = vadd.f32 %v497_v5, %v495_v12  ;;  %v456_v31 = vadd.f32 %v453_v10, %v452_v11  ;;  %v548_v32 = vadd.f32 %v545_v13, %v544_v22  ;;  %v831_v40 = vpop.eup %830 }
  0xba   : > { %v496_v24 = vmul.f32 %v829_v16, %v491_v15  ;;  %v430_v26 = vmul.f32 %v426_v18, %v418_v17  ;;  %v522_v27 = vsub.f32 1.0, %v518_v19  ;;  %v833_v42 = vpop.eup %832  ;;  %v660_v51 = vxor.u32 2147483648, %v831_v40 }
  0xbb   : > { %v657_v50 = vxor.u32 2147483648, %v833_v42  ;;  %vm656_vm9 = vcmp.eq.s32.totalorder %v654_v45, 0  ;;  %vm659_vm10 = vcmp.eq.s32.totalorder %v654_v45, 2  ;;  %vm655_vm11 = vcmp.lt.s32.totalorder %v654_v45, 2 }
  0xbc   : > { %v499_v33 = vadd.f32 %v498_v23, %v496_v24  ;;  %v542_v34 = vpop.permute.xlu1 %541  ;;  %v454_v36 = vmul.f32 %v445_v60, %v430_v26  ;;  %v546_v37 = vmul.f32 %v537_v14, %v522_v27  ;;  %v661_v59 = vsel %vm659_vm10, %v660_v51, %v833_v42 }
  0xbd   : > { %v450_v35 = vpop.permute.xlu0 %449  ;;  %v547_v38 = vmul.f32 %v542_v34, %v523_v28  ;;  %v658_v58 = vsel %vm656_vm9, %v831_v40, %v657_v50 }
  0xbe   : > { %v455_v39 = vmul.f32 %v450_v35, %v431_v29  ;;  %v500_v41 = vrot.slane %v499_v33, 4  ;;  %v457_v43 = vadd.f32 %v456_v31, %v454_v36  ;;  %v549_v44 = vadd.f32 %v548_v32, %v546_v37 }
  0xbf   : > { %v662_v2 = vsel %vm655_vm11, %v658_v58, %v661_v59 }
  0xc0   : > { %v501_v46 = vadd.f32 %v500_v41, %v499_v33  ;;  %v550_v49 = vadd.f32 %v549_v44, %v547_v38  ;;  %v458_v47 = vadd.f32 %v457_v43, %v455_v39  ;;  %v663_v5 = vsel %vm652_vm12, nan, %v662_v2 }
  0xc2   : > { %v502_v48 = vrot.slane %v501_v46, 2  ;;  %v551_v52 = vrot.slane %v550_v49, 4  ;;  %v459_v53 = vrot.slane %v458_v47, 4 }
  0xc4   : > { %v503_v54 = vadd.f32 %v502_v48, %v501_v46  ;;  %v552_v55 = vadd.f32 %v551_v52, %v550_v49  ;;  %v460_v56 = vadd.f32 %v459_v53, %v458_v47 }
  0xc6   : > { %v504_v57 = vrot.slane %v503_v54, 1  ;;  %v553_v60 = vrot.slane %v552_v55, 2  ;;  %v461_v61 = vrot.slane %v460_v56, 2 }
  0xc8   : > { %v505_v62 = vadd.f32 %v504_v57, %v503_v54  ;;  %v554_v0 = vadd.f32 %v553_v60, %v552_v55  ;;  %v462_v1 = vadd.f32 %v461_v61, %v460_v56 }
  0xca   : > { %v555_v3 = vrot.slane %v554_v0, 1  ;;  %v463_v4 = vrot.slane %v462_v1, 1  ;;  %v507_v30 = vadd.f32 %v506_v63, %v505_v62 }
  0xcc   : > { %v556_v6 = vadd.f32 %v555_v3, %v554_v0  ;;  %v464_v7 = vadd.f32 %v463_v4, %v462_v1  ;;  %v558_v9 = vmul.f32 %v507_v30, %v507_v30 }
  0xce   : > { %v557_v8 = vmul.f32 %v464_v7, %v464_v7  ;;  %v664_v10 = vsub.f32 %v556_v6, %v663_v5 }
  0xd0   : > { %v559_v11 = vadd.f32 %v558_v9, %v557_v8  ;;  %v665_v12 = vmul.f32 %v664_v10, %v664_v10 }
  0xd2   : > { %v666_v13 = vadd.f32 %v665_v12, %v559_v11 }
  0xd4   : > { %667 = vst [vmem:[%s278_s30] sm:$0x1] %v666_v13 }
  0xd5   : > { %847 = shalt.err (!%p844_p3)
}
  0xd6   : > { %s848_s21 = scalar_lea.hbm %s1113_s15, 16  ;;  %s852_s19 = scalar_lea.hbm %s1162_s7, 32 }
  0xd7   : > { %p849_p4 = scmp.ne.s32.totalorder %s1113_s15, %s848_s21  ;;  %p853_p9 = scmp.lt.u32.totalorder %s1113_s15, %s1162_s7 }
  0xd8   : > { %p854_p10 = scmp.lt.u32.totalorder %s852_s19, %s848_s21  ;;  %p856_p12 = scmp.lt.u32.totalorder %s848_s21, %s1113_s15 }
  0xd9   : > { %p850_p7 = pnand %p849_p4, %p987_p5 }
  0xda   : > { %p855_p11 = por %p854_p10, %p853_p9 }
  0xdb   : > { %p851_p8 = pneg %p850_p7 }
  0xdc   : > { %p857_p13 = por %p856_p12, %p855_p11 }
  0xde   : > { %p858_p0 = pnand %p857_p13, %p851_p8 }
  0xe0   : > { %861 = shalt.err (!%p858_p0)
}
  0xe1   : > { %758 = dma.vmem_to_hbm [thread:$0]  (%p987_p5), %s1115_s9, 16, %s1113_s15, %s669_s16  }
  0xe2 PF: > { %p764_p1 = scmp.ge.s32.totalorder %s896_s29, 2  ;;  %s693_s30 = sand.u32 1, %s884_s26  }
  0xe3   : > { %s694_s10 = scalar_lea.sflag [#allocation4], %s693_s30 }
  0xe4   : > { %p761_p2 = pnand %p764_p1, %p991_p6 }
  0xe6   : > { %879 = dma.done.wait (!%p761_p2), %s694_s10, 16  }
  0xe7   : > { %881 = vsyncadd (!%p761_p2), %s694_s10, 4294967280  ;;  %p18_p3 = scmp.ge.s32.totalorder %s974_s8, 4   ;;  %s1167_s26 = smov %s888_s27 }
  0xe8   : > { %s1168_s27 = smov %s892_s28  ;;  %s1169_s28 = smov %s985_s11 }
  0xe9   : > { %s1170_s29 = smov %s974_s8  ;;  %20 = sbr.rel (!%p18_p3) target bundleno = 5 (0x5), region = 86 }
  0xf0   :  { %698 = vsyncpa [#allocation4], 1 }
  0xf1   :  { %700 = vsyncpa [#allocation4 + $0x1], 1 }

</bundles_post_ra>
